<compile_context>
chip_gen: v7x
topology: tpu7x:2x2x1
jax: 0.10.0
libtpu: 0.0.40
codegen_flags: <defaults>
</compile_context>

<pallas_src>
import functools

import jax
import jax.numpy as jnp
from jax.experimental import pallas as pl
from jax.experimental.pallas import tpu as pltpu


def _round_up(x, m):
    return (x + m - 1) // m * m


def _linear_kernel(x_ref, w_ref, b_ref, o_ref):
    # x_ref: (TB, K)    bf16  -- one batch tile (streamed)
    # w_ref: (Npad, K)  bf16  -- resident, un-transposed (out_features, in_features)
    # b_ref: (1, Npad)  f32   -- resident
    # o_ref: (TB, Npad) f32   -- lane-dense output tile
    acc = jax.lax.dot_general(
        x_ref[...], w_ref[...],
        dimension_numbers=(((1,), (1,)), ((), ())),   # contract K of both operands
        preferred_element_type=jnp.float32,
    )
    o_ref[...] = acc + b_ref[...]                     # f32 epilogue (v5e-safe)


@functools.partial(jax.jit, static_argnames=("tile_b",))
def mclr_forward(x, weight, bias, *, tile_b=2048):
    """Forward of Mclr_CrossEntropy: flatten(x, 1) -> Linear(K, N) logits.

    Args:
      x:      (B, ...) any trailing shape; flattened to (B, K) like torch.flatten(x, 1).
      weight: (N, K) PyTorch nn.Linear layout (out_features, in_features).
      bias:   (N,)
      tile_b: batch tile size (rounded to a multiple of 8, clamped to the batch).
    Returns:
      logits: (B, N) float32
    """
    B = x.shape[0]
    x2d = x.reshape(B, -1)
    K = x2d.shape[1]
    N, Kw = weight.shape
    assert Kw == K, (weight.shape, K)

    N_PAD = 128  # lane-dense output (real N sliced back in the wrapper)

    # bf16 for the DMA / MXU inputs; f32 accumulation + bias add inside the kernel.
    x_bf = x2d.astype(jnp.bfloat16)
    w_p = jnp.zeros((N_PAD, K), jnp.bfloat16).at[:N, :].set(weight.astype(jnp.bfloat16))
    b_p = jnp.zeros((1, N_PAD), jnp.float32).at[0, :N].set(bias.astype(jnp.float32))

    # Batch tiling: the block's second-to-last dim must be a multiple of 8
    # (or the full extent), so both the tile and the padded batch are 8-aligned.
    tb = max(8, _round_up(min(tile_b, B), 8))
    Bp = _round_up(B, tb)
    if Bp != B:
        x_bf = jnp.pad(x_bf, ((0, Bp - B), (0, 0)))

    out = pl.pallas_call(
        _linear_kernel,
        out_shape=jax.ShapeDtypeStruct((Bp, N_PAD), jnp.float32),
        grid_spec=pltpu.PrefetchScalarGridSpec(
            num_scalar_prefetch=0,
            grid=(Bp // tb,),
            in_specs=[
                pl.BlockSpec((tb, K), lambda i: (i, 0)),      # x: streamed per batch tile
                pl.BlockSpec((N_PAD, K), lambda i: (0, 0)),   # W: resident across the grid
                pl.BlockSpec((1, N_PAD), lambda i: (0, 0)),   # b: resident across the grid
            ],
            out_specs=pl.BlockSpec((tb, N_PAD), lambda i: (i, 0)),
        ),
        compiler_params=pltpu.CompilerParams(
            dimension_semantics=("parallel",),  # batch tiles shard across TCs on v7x
        ),
    )(x_bf, w_p, b_p)

    return out[:B, :N]


if __name__ == "__main__":
    input_dim, output_dim = 784, 10
    batch = 8

    key = jax.random.PRNGKey(0)
    kx, kw, kb = jax.random.split(key, 3)

    # Deterministic "PyTorch-like" init: U(-1/sqrt(in), 1/sqrt(in))
    bound = 1.0 / jnp.sqrt(jnp.float32(input_dim))
    weight = jax.random.uniform(kw, (output_dim, input_dim),
                                minval=-bound, maxval=bound, dtype=jnp.float32)
    bias = jax.random.uniform(kb, (output_dim,),
                              minval=-bound, maxval=bound, dtype=jnp.float32)

    # MNIST-like input (B, 1, 28, 28) -> flatten to (B, 784)
    x = jax.random.normal(kx, (batch, 1, 28, 28), dtype=jnp.float32)

    logits = mclr_forward(x, weight, bias)
    jax.block_until_ready(logits)

    # Reference computed with the same bf16-rounded operands (kernel streams
    # bf16 inputs but accumulates in f32).
    x_ref = x.reshape(batch, -1).astype(jnp.bfloat16).astype(jnp.float32)
    w_ref = weight.astype(jnp.bfloat16).astype(jnp.float32)
    ref = x_ref @ w_ref.T + bias

    assert logits.shape == (batch, output_dim), logits.shape
    assert logits.dtype == jnp.float32, logits.dtype
    err = float(jnp.max(jnp.abs(logits - ref)))
    assert jnp.allclose(logits, ref, atol=1e-3, rtol=1e-3), err

    print("KERNEL_OK")
</pallas_src>

<mosaic_0001>
module attributes {stable_mosaic.version = 11 : i64} {
  func.func @_linear_kernel(%arg0: i32, %arg1: memref<8x784xbf16, #tpu.memory_space<vmem>>, %arg2: memref<128x784xbf16, #tpu.memory_space<vmem>>, %arg3: memref<1x128xf32, #tpu.memory_space<vmem>>, %arg4: memref<8x128xf32, #tpu.memory_space<vmem>>) attributes {dimension_semantics = [#tpu.dimension_semantics<parallel>], iteration_bounds = array<i64: 1>, scalar_prefetch = 0 : i64, scratch_operands = 0 : i64, tpu.core_type = #tpu.core_type<tc>, window_params = [{transform_indices = @transform_0, window_bounds = array<i64: 8, 784>}, {pipeline_mode = #tpu.pipeline_mode<synchronous>, transform_indices = @transform_1, window_bounds = array<i64: 128, 784>}, {pipeline_mode = #tpu.pipeline_mode<synchronous>, transform_indices = @transform_2, window_bounds = array<i64: 1, 128>}, {transform_indices = @transform_3, window_bounds = array<i64: 8, 128>}]} {
    %c0 = arith.constant 0 : index
    %c0_0 = arith.constant 0 : index
    %0 = vector.load %arg1[%c0, %c0_0] : memref<8x784xbf16, #tpu.memory_space<vmem>>, vector<8x784xbf16>
    %c0_1 = arith.constant 0 : index
    %c0_2 = arith.constant 0 : index
    %1 = vector.load %arg2[%c0_1, %c0_2] : memref<128x784xbf16, #tpu.memory_space<vmem>>, vector<128x784xbf16>
    %cst = arith.constant dense<0.000000e+00> : vector<8x128xf32>
    %2 = tpu.matmul %0, %1, %cst {dimension_numbers = #tpu.dot_dimension_numbers<[1], [1], [0], [0], [0, 0, 1, 0], [], []>} : vector<8x784xbf16>, vector<128x784xbf16>, vector<8x128xf32> -> vector<8x128xf32>
    %c0_3 = arith.constant 0 : index
    %c0_4 = arith.constant 0 : index
    %3 = vector.load %arg3[%c0_3, %c0_4] : memref<1x128xf32, #tpu.memory_space<vmem>>, vector<1x128xf32>
    %4 = vector.broadcast %3 : vector<1x128xf32> to vector<8x128xf32>
    %5 = arith.addf %2, %4 : vector<8x128xf32>
    %c0_5 = arith.constant 0 : index
    %c0_6 = arith.constant 0 : index
    %6 = vector.load %arg4[%c0_5, %c0_6] : memref<8x128xf32, #tpu.memory_space<vmem>>, vector<8x128xf32>
    tpu.vector_store %arg4[%c0_5, %c0_6], %5 {strides = array<i32>} : memref<8x128xf32, #tpu.memory_space<vmem>>, vector<8x128xf32>,
    return
  }
  func.func @transform_0(%arg0: i32) -> (i32, i32) {
    %c0_i32 = arith.constant 0 : i32
    %c0_i32_0 = arith.constant 0 : i32
    return %arg0, %c0_i32 : i32, i32
  }
  func.func @transform_1(%arg0: i32) -> (i32, i32) {
    %c0_i32 = arith.constant 0 : i32
    %c0_i32_0 = arith.constant 0 : i32
    %c0_i32_1 = arith.constant 0 : i32
    return %c0_i32, %c0_i32_0 : i32, i32
  }
  func.func @transform_2(%arg0: i32) -> (i32, i32) {
    %c0_i32 = arith.constant 0 : i32
    %c0_i32_0 = arith.constant 0 : i32
    %c0_i32_1 = arith.constant 0 : i32
    return %c0_i32, %c0_i32_0 : i32, i32
  }
  func.func @transform_3(%arg0: i32) -> (i32, i32) {
    %c0_i32 = arith.constant 0 : i32
    %c0_i32_0 = arith.constant 0 : i32
    return %arg0, %c0_i32 : i32, i32
  }
}

</mosaic_0001>

<bundles_post_ra>
// kernel: mclr_forward.1
= control target key start
LH: loop header
LB: loop body
LE: loop exit
PB: predicated region body
PF: predicated region fallthrough
CT: control target
= control target key end

     0   :  { %s1058_s0 = inlined_call_operand.vmem [shape: bf16[8,784], index: 0, kind: input, shape index: {}]   ;;  %s1059_s1 = inlined_call_operand.vmem [shape: bf16[128,784], index: 1, kind: input, shape index: {}]   ;;  %s1060_s2 = inlined_call_operand.vmem [shape: f32[1,128], index: 2, kind: input, shape index: {}]   ;;  %s1061_s3 = inlined_call_operand.hbm [shape: f32[8,128], index: 3, kind: output, shape index: {}]  }
   0x1   :  { %v705_v0 = vld [vmem:[%s1059_s1 + $0x4] ss:$28 sps:$4 sm:$0xff]   ;;  %v707_v1 = vld [vmem:[%s1059_s1 + $0x14] ss:$28 sps:$4 sm:$0xff]   ;;  %v711_v4 = vld [vmem:[%s1059_s1 + $0x3c] ss:$28 sps:$4 sm:$0xff]  }
   0x2   :  { %423 = vmatprep.subr.bf16.mxu1 %v705_v0  ;;  %v709_v2 = vld [vmem:[%s1059_s1] ss:$28 sps:$4 sm:$0xff]   ;;  %v710_v3 = vld [vmem:[%s1059_s1 + $0x10] ss:$28 sps:$4 sm:$0xff]   ;;  %503 = vmatprep.subr.bf16.mxu0 %v707_v1  ;;  %v715_v6 = vld [vmem:[%s1059_s1 + $0x38] ss:$28 sps:$4 sm:$0xff]  }
   0x3   :  { %424 = vmatpush1.bf16.xpose.msra.mxu1 %v709_v2  ;;  %504 = vmatpush1.bf16.xpose.msra.mxu0 %v710_v3  ;;  %v713_v5 = vld [vmem:[%s1059_s1 + $0x4c] ss:$28 sps:$4 sm:$0xff]   ;;  %v717_v8 = vld [vmem:[%s1059_s1 + $0x74] ss:$28 sps:$4 sm:$0xff]   ;;  %v719_v9 = vld [vmem:[%s1059_s1 + $0x84] ss:$28 sps:$4 sm:$0xff]  }
   0x4   :  { %425 = vmatprep.subr.bf16.mxu1 %v711_v4  ;;  %505 = vmatprep.subr.bf16.mxu0 %v713_v5  ;;  %v716_v7 = vld [vmem:[%s1059_s1 + $0x48] ss:$28 sps:$4 sm:$0xff]   ;;  %v721_v10 = vld [vmem:[%s1059_s1 + $0x70] ss:$28 sps:$4 sm:$0xff]   ;;  %v722_v11 = vld [vmem:[%s1059_s1 + $0x80] ss:$28 sps:$4 sm:$0xff]  }
   0x5   :  { %v723_v12 = vld [vmem:[%s1059_s1 + $0xac] ss:$28 sps:$4 sm:$0xff]   ;;  %v725_v13 = vld [vmem:[%s1059_s1 + $0xbc] ss:$28 sps:$4 sm:$0xff]   ;;  %v16_v14 = vld [vmem:[%s1058_s0] sm:$0xff] }
   0x6   :  { %v727_v15 = vld [vmem:[%s1059_s1 + $0xa8] ss:$28 sps:$4 sm:$0xff]   ;;  %v600_v16 = vcombine.high %v16_v14, %v16_v14  ;;  %v18_v17 = vld [vmem:[%s1058_s0 + $0x10] sm:$0xff]  ;;  %v733_v22 = vld [vmem:[%s1059_s1 + $0xe0] ss:$28 sps:$4 sm:$0xff]  }
   0x7   :  { %v728_v18 = vld [vmem:[%s1059_s1 + $0xb8] ss:$28 sps:$4 sm:$0xff]   ;;  %v604_v19 = vcombine.high %v18_v17, %v18_v17  ;;  %v729_v20 = vld [vmem:[%s1059_s1 + $0xe4] ss:$28 sps:$4 sm:$0xff]   ;;  %v734_v23 = vld [vmem:[%s1059_s1 + $0xf0] ss:$28 sps:$4 sm:$0xff]  }
   0x8   :  { %455 = vmatprep.mubr.bf16.mxu1 %v600_v16  ;;  %v731_v21 = vld [vmem:[%s1059_s1 + $0xf4] ss:$28 sps:$4 sm:$0xff]   ;;  %v735_v24 = vld [vmem:[%s1059_s1 + $0x11c] ss:$28 sps:$4 sm:$0xff]   ;;  %v737_v25 = vld [vmem:[%s1059_s1 + $0x12c] ss:$28 sps:$4 sm:$0xff]  }
   0x9   :  { %535 = vmatprep.mubr.bf16.mxu0 %v604_v19  ;;  %v739_v26 = vld [vmem:[%s1059_s1 + $0x118] ss:$28 sps:$4 sm:$0xff]   ;;  %v740_v27 = vld [vmem:[%s1059_s1 + $0x128] ss:$28 sps:$4 sm:$0xff]  }
   0xa   :  { %v741_v28 = vld [vmem:[%s1059_s1 + $0x154] ss:$28 sps:$4 sm:$0xff]   ;;  %v743_v29 = vld [vmem:[%s1059_s1 + $0x164] ss:$28 sps:$4 sm:$0xff]  }
   0xb   :  { %426 = vmatpush1.bf16.xpose.msra.mxu1 %v715_v6  ;;  %506 = vmatpush1.bf16.xpose.msra.mxu0 %v716_v7 }
   0xc   :  { %427 = vmatprep.subr.bf16.mxu1 %v717_v8  ;;  %507 = vmatprep.subr.bf16.mxu0 %v719_v9 }
  0x13   :  { %428 = vmatpush1.bf16.xpose.msra.mxu1 %v721_v10  ;;  %508 = vmatpush1.bf16.xpose.msra.mxu0 %v722_v11 }
  0x14   :  { %429 = vmatprep.subr.bf16.mxu1 %v723_v12  ;;  %509 = vmatprep.subr.bf16.mxu0 %v725_v13 }
  0x1b   :  { %430 = vmatpush1.bf16.xpose.msra.mxu1 %v727_v15  ;;  %510 = vmatpush1.bf16.xpose.msra.mxu0 %v728_v18 }
  0x1c   :  { %431 = vmatprep.subr.bf16.mxu1 %v729_v20  ;;  %511 = vmatprep.subr.bf16.mxu0 %v731_v21 }
  0x23   :  { %432 = vmatpush1.bf16.xpose.msra.mxu1 %v733_v22  ;;  %512 = vmatpush1.bf16.xpose.msra.mxu0 %v734_v23 }
  0x24   :  { %433 = vmatprep.subr.bf16.mxu1 %v735_v24  ;;  %513 = vmatprep.subr.bf16.mxu0 %v737_v25 }
  0x25   :  { %8 = vsyncpa [#allocation3], 0  ;;  %v745_v30 = vld [vmem:[%s1059_s1 + $0x150] ss:$28 sps:$4 sm:$0xff]   ;;  %v746_v31 = vld [vmem:[%s1059_s1 + $0x160] ss:$28 sps:$4 sm:$0xff]   ;;  %v599_v39 = vcombine.low %v16_v14, %v16_v14  ;;  %v603_v40 = vcombine.low %v18_v17, %v18_v17 }
  0x26   :  { %v747_v32 = vld [vmem:[%s1059_s1 + $0x18c] ss:$28 sps:$4 sm:$0xff]   ;;  %v749_v33 = vld [vmem:[%s1059_s1 + $0x19c] ss:$28 sps:$4 sm:$0xff]   ;;  %v816_v37 = vmov 0.0   ;;  %vm395_vm0 = vcmask 130048  }
  0x27   :  { %v751_v34 = vld [vmem:[%s1059_s1 + $0x188] ss:$28 sps:$4 sm:$0xff]   ;;  %v752_v35 = vld [vmem:[%s1059_s1 + $0x198] ss:$28 sps:$4 sm:$0xff]   ;;  %v764_v46 = vld [vmem:[%s1059_s1 + $0x50] ss:$28 sps:$4 sm:$0xff]  }
  0x28   :  { %v757_v36 = vld [vmem:[%s1059_s1 + $0xc] ss:$28 sps:$4 sm:$0xff]   ;;  %v760_v38 = vld [vmem:[%s1059_s1 + $0x18] ss:$28 sps:$4 sm:$0xff]   ;;  %v763_v44 = vld [vmem:[%s1059_s1 + $0x44] ss:$28 sps:$4 sm:$0xff]  }
  0x29   :  { %v951_v41 = vld [vmem:[%s1058_s0 + $0x8] sm:$0xff]  ;;  %v400_v43 = vsel %vm395_vm0, %v760_v38, 0  ;;  %vm817_vm1 = vmmov 0   ;;  %v761_v47 = vld [vmem:[%s1059_s1 + $0x40] ss:$28 sps:$4 sm:$0xff]   ;;  %v403_v48 = vsel %vm395_vm0, %v764_v46, 0 }
  0x2a   :  { %v755_v42 = vld [vmem:[%s1059_s1 + $0x8] ss:$28 sps:$4 sm:$0xff]   ;;  %v602_v45 = vcombine.high %v951_v41, %v951_v41  ;;  %v767_v49 = vld [vmem:[%s1059_s1 + $0x7c] ss:$28 sps:$4 sm:$0xff]   ;;  %v771_v53 = vld [vmem:[%s1059_s1 + $0xb4] ss:$28 sps:$4 sm:$0xff]   ;;  %v601_v9 = vcombine.low %v951_v41, %v951_v41 }
  0x2b   :  { %434 = vmatpush1.bf16.xpose.msra.mxu1 %v739_v26  ;;  %514 = vmatpush1.bf16.xpose.msra.mxu0 %v740_v27  ;;  %v768_v50 = vld [vmem:[%s1059_s1 + $0x88] ss:$28 sps:$4 sm:$0xff]   ;;  %v765_v51 = vld [vmem:[%s1059_s1 + $0x78] ss:$28 sps:$4 sm:$0xff]   ;;  %v772_v54 = vld [vmem:[%s1059_s1 + $0xc0] ss:$28 sps:$4 sm:$0xff]  }
  0x2c   :  { %435 = vmatprep.subr.bf16.mxu1 %v741_v28  ;;  %515 = vmatprep.subr.bf16.mxu0 %v743_v29  ;;  %v406_v52 = vsel %vm395_vm0, %v768_v50, 0  ;;  %v769_v55 = vld [vmem:[%s1059_s1 + $0xb0] ss:$28 sps:$4 sm:$0xff]   ;;  %v409_v56 = vsel %vm395_vm0, %v772_v54, 0  ;;  %v776_v58 = vld [vmem:[%s1059_s1 + $0xf8] ss:$28 sps:$4 sm:$0xff]  }
  0x2d   :  { %v775_v57 = vld [vmem:[%s1059_s1 + $0xec] ss:$28 sps:$4 sm:$0xff]   ;;  %v412_v60 = vsel %vm395_vm0, %v776_v58, 0  ;;  %v779_v61 = vld [vmem:[%s1059_s1 + $0x124] ss:$28 sps:$4 sm:$0xff]  }
  0x2e   :  { %v773_v59 = vld [vmem:[%s1059_s1 + $0xe8] ss:$28 sps:$4 sm:$0xff]   ;;  %v780_v62 = vld [vmem:[%s1059_s1 + $0x130] ss:$28 sps:$4 sm:$0xff]   ;;  %v777_v63 = vld [vmem:[%s1059_s1 + $0x120] ss:$28 sps:$4 sm:$0xff]  }
  0x2f   :  { %v415_v0 = vsel %vm395_vm0, %v780_v62, 0  ;;  %v783_v1 = vld [vmem:[%s1059_s1 + $0x15c] ss:$28 sps:$4 sm:$0xff]   ;;  %v784_v2 = vld [vmem:[%s1059_s1 + $0x168] ss:$28 sps:$4 sm:$0xff]  }
  0x30   :  { %v781_v3 = vld [vmem:[%s1059_s1 + $0x158] ss:$28 sps:$4 sm:$0xff]   ;;  %v418_v4 = vsel %vm395_vm0, %v784_v2, 0  ;;  %v788_v6 = vld [vmem:[%s1059_s1 + $0x1a0] ss:$28 sps:$4 sm:$0xff]  }
  0x31   :  { %v787_v5 = vld [vmem:[%s1059_s1 + $0x194] ss:$28 sps:$4 sm:$0xff]   ;;  %v421_v8 = vsel %vm395_vm0, %v788_v6, 0  ;;  %v791_v10 = vld [vmem:[%s1058_s0 + $0x18] ss:$0 sps:$4 sm:$0xff]  }
  0x32   :  { %v785_v7 = vld [vmem:[%s1059_s1 + $0x190] ss:$28 sps:$4 sm:$0xff]   ;;  %v598_v11 = vld [vmem:[%s1060_s2] ss:$0 sm:$0xff]  ;;  %s818_s1 = smov [#allocation2]  }
  0x33   :  { %436 = vmatpush1.bf16.xpose.msra.mxu1 %v745_v30  ;;  %516 = vmatpush1.bf16.xpose.msra.mxu0 %v746_v31  ;;  %s590_s26 = sshll.u32 %s818_s1, 4  ;;  %s591_s26 = int_to_ptr.vmem [resolvable:$true] %s590_s26 }
  0x34   :  { %437 = vmatprep.subr.bf16.mxu1 %v747_v32  ;;  %517 = vmatprep.subr.bf16.mxu0 %v749_v33  ;;  %s792_s0 = scalar_lea.vmem %s591_s26, 128  ;;  %p797_p1 = scmp.lt.s32.totalorder %s591_s26, %s591_s26 }
  0x35   :  { %p793_p0 = scmp.ne.s32.totalorder %s591_s26, %s792_s0  ;;  %p798_p2 = scmp.lt.s32.totalorder %s792_s0, %s792_s0 }
  0x37   :  { %p799_p3 = por %p798_p2, %p797_p1 }
  0x39   :  { %p800_p4 = pnand %p799_p3, %p793_p0 }
  0x3b   :  { %438 = vmatpush1.bf16.xpose.msra.mxu1 %v751_v34  ;;  %518 = vmatpush1.bf16.xpose.msra.mxu0 %v752_v35 }
  0x3c   :  { %463 = vmatprep.subr.bf16.mxu1 %v757_v36  ;;  %672 = vmatprep.subr.bf16.mxu0 %v816_v37 }
  0x42   :  { %456 = vmatmul.mubr.bf16.vlgmr.msra.gmra.mrb[0].mxu1 %v599_v39  ;;  %536 = vmatmul.mubr.bf16.vlgmr.msra.gmra.mrb[0].mxu0 %v603_v40 }
  0x43   :  { %464 = vmatpush1.bf16.xpose.msra.mxu1 %v755_v42  ;;  %673 = vmatpush3.bf16.xpose.msra.mxu0 %v400_v43 }
  0x44   :  { %465 = vmatprep.subr.bf16.mxu1 %v763_v44  ;;  %674 = vmatprep.subr.bf16.mxu0 %v816_v37 }
  0x45   :  { %495 = vmatprep.mubr.bf16.mxu1 %v602_v45  ;;  %688 = vmatprep.mubr.msk.bf16.mxu0 %vm817_vm1, %v816_v37 }
  0x4b   :  { %466 = vmatpush1.bf16.xpose.msra.mxu1 %v761_v47  ;;  %675 = vmatpush3.bf16.xpose.msra.mxu0 %v403_v48 }
  0x4c   :  { %467 = vmatprep.subr.bf16.mxu1 %v767_v49  ;;  %676 = vmatprep.subr.bf16.mxu0 %v816_v37 }
  0x53   :  { %468 = vmatpush1.bf16.xpose.msra.mxu1 %v765_v51  ;;  %677 = vmatpush3.bf16.xpose.msra.mxu0 %v406_v52 }
  0x54   :  { %469 = vmatprep.subr.bf16.mxu1 %v771_v53  ;;  %678 = vmatprep.subr.bf16.mxu0 %v816_v37 }
  0x5b   :  { %470 = vmatpush1.bf16.xpose.msra.mxu1 %v769_v55  ;;  %679 = vmatpush3.bf16.xpose.msra.mxu0 %v409_v56 }
  0x5c   :  { %471 = vmatprep.subr.bf16.mxu1 %v775_v57  ;;  %680 = vmatprep.subr.bf16.mxu0 %v816_v37 }
  0x63   :  { %472 = vmatpush1.bf16.xpose.msra.mxu1 %v773_v59  ;;  %681 = vmatpush3.bf16.xpose.msra.mxu0 %v412_v60 }
  0x64   :  { %473 = vmatprep.subr.bf16.mxu1 %v779_v61  ;;  %682 = vmatprep.subr.bf16.mxu0 %v816_v37 }
  0x6b   :  { %474 = vmatpush1.bf16.xpose.msra.mxu1 %v777_v63  ;;  %683 = vmatpush3.bf16.xpose.msra.mxu0 %v415_v0 }
  0x6c   :  { %475 = vmatprep.subr.bf16.mxu1 %v783_v1  ;;  %684 = vmatprep.subr.bf16.mxu0 %v816_v37 }
  0x73   :  { %476 = vmatpush1.bf16.xpose.msra.mxu1 %v781_v3  ;;  %685 = vmatpush3.bf16.xpose.msra.mxu0 %v418_v4 }
  0x74   :  { %477 = vmatprep.subr.bf16.mxu1 %v787_v5  ;;  %686 = vmatprep.subr.bf16.mxu0 %v816_v37 }
  0x7b   :  { %478 = vmatpush1.bf16.xpose.msra.mxu1 %v785_v7  ;;  %687 = vmatpush3.bf16.xpose.msra.mxu0 %v421_v8 }
  0x82   :  { %496 = vmatmul.mubr.bf16.vlgmr.msra.gmra.mrb[0].mxu1 %v601_v9  ;;  %689 = vmatmul.mubr.msk.bf16.vlgmr.msra.gmra.mrb[0].mxu0 %vm395_vm0, %v791_v10 }
 0x155   :  { %v497_v12 = vpop.f32.mrb[0].mxu1  ;;  %v577_v13 = vpop.f32.mrb[0].mxu0 }
 0x156   :  { %v692_v14 = vadd.f32 %v598_v11, %v497_v12  ;;  %v499_v15 = vpop.f32.mrb[1].mxu1  ;;  %v690_v16 = vpop.f32.mrb[1].mxu0 }
 0x157   :  { %v500_v17 = vpop.f32.mrb[2].mxu1  ;;  %v580_v18 = vpop.f32.mrb[2].mxu0 }
 0x158   :  { %v693_v19 = vadd.f32 %v692_v14, %v577_v13  ;;  %v501_v20 = vpop.f32.mrb[3].mxu1  ;;  %v691_v21 = vpop.f32.mrb[3].mxu0 }
 0x15a   :  { %583 = vst [vmem:[#allocation2] sm:$0xff] %v693_v19 }
 0x15b   :  { %803 = shalt.err (!%p800_p4)
}
 0x15c   :  { %s804_s28 = scalar_lea.hbm %s1061_s3, 128 }
 0x15d   :  { %p805_p5 = scmp.ne.s32.totalorder %s1061_s3, %s804_s28  ;;  %p808_p6 = scmp.lt.u32.totalorder %s804_s28, %s1061_s3 }
 0x15f   :  { %p810_p7 = pnand %p808_p6, %p805_p5 }
 0x161   :  { %813 = shalt.err (!%p810_p7)
}
 0x162   :  { %593 = dma.vmem_to_hbm [thread:$0]  %s591_s26, 128, %s1061_s3, [#allocation3]  }
 0x163   :  { %814 = dma.done.wait [#allocation3], 128  }
 0x164   :  { %815 = vsyncadd [#allocation3], 4294967168 }
 0x165   :  { %597 = vsyncpa [#allocation3], 1 }

</bundles_post_ra>
